<compile_context>
chip_gen: v7x
topology: tpu7x:2x2x1
jax: 0.10.0
libtpu: 0.0.40
codegen_flags: <defaults>
</compile_context>

<pallas_src>
import jax
import jax.numpy as jnp
from jax.experimental import pallas as pl
from jax.experimental.pallas import tpu as pltpu


def _gelu_tanh(x):
    # tanh-approximate GELU, matching F.gelu(x, approximate='tanh')
    c = 0.7978845608028654  # sqrt(2/pi)
    return 0.5 * x * (1.0 + jnp.tanh(c * (x + 0.044715 * x * x * x)))


def _round_up(n, m):
    return ((n + m - 1) // m) * m


def _pick_inter_tile(i_dim, cap=1024):
    """Largest multiple of 128 that divides i_dim and is <= cap."""
    t = min(i_dim, cap)
    t = max((t // 128) * 128, 128)
    while t > 128 and i_dim % t != 0:
        t -= 128
    return t


def _tpu_info():
    """Best-effort (device_kind, vmem_capacity_bytes) with safe fallbacks."""
    kind = ""
    try:
        kind = jax.devices()[0].device_kind.lower()
    except Exception:
        pass
    vmem = None
    try:
        vmem = getattr(pltpu.get_tpu_info(), "vmem_capacity_bytes", None)
    except Exception:
        vmem = None
    if vmem is None:
        if "v7" in kind:
            vmem = 64 << 20
        elif ("v5" in kind) or ("v6" in kind):
            vmem = 128 << 20
        else:
            vmem = 64 << 20  # conservative default
    return kind, int(vmem)


def prepare_ffn_params(w1, b1, w2, b2, *, use_bf16_matmul=True, ti=None):
    """One-time parameter prep (do NOT repeat per forward call).

    Stores weights in the MXU dtype and in a chunked layout:
      w1c: (nj, D, ti)   chunk j == w1[:, j*ti:(j+1)*ti]
      b1c: (nj, 1, ti)
      w2c: (nj, ti, D)   chunk j == w2[j*ti:(j+1)*ti, :]
      b2c: (1, D)        (kept in f32)
    """
    D, I = w1.shape
    assert w2.shape == (I, D) and b1.shape == (I,) and b2.shape == (D,)
    assert D % 128 == 0 and I % 128 == 0, "dims must be lane-aligned (mult of 128)"
    if ti is None:
        ti = _pick_inter_tile(I, cap=1024)
    assert I % ti == 0 and ti % 128 == 0
    nj = I // ti
    wdt = jnp.bfloat16 if use_bf16_matmul else w1.dtype
    w1c = w1.astype(wdt).reshape(D, nj, ti).transpose(1, 0, 2)  # (nj, D, ti)
    w2c = w2.astype(wdt).reshape(nj, ti, D)                     # (nj, ti, D)
    b1c = b1.astype(jnp.float32).reshape(nj, 1, ti)
    b2c = b2.astype(jnp.float32).reshape(1, D)
    return w1c, b1c, w2c, b2c


def _make_ffn_kernel(*, resident_weights, acc_in_out, gelu_dtype):
    def kernel(x_ref, w1_ref, b1_ref, w2_ref, b2_ref, o_ref, *scratch):
        # Grid: (i over token tiles [parallel], j over I-chunks [arbitrary]).
        # x_ref:  (tm, D)      token tile (resident across j; already MXU dtype)
        # w1_ref: (1|nj, D, ti) c_fc weight chunk(s)
        # b1_ref: (1|nj, 1, ti) c_fc bias chunk(s), f32
        # w2_ref: (1|nj, ti, D) c_proj weight chunk(s)
        # b2_ref: (1, D)        c_proj bias, f32
        # o_ref:  (tm, D)       output tile (doubles as f32 accumulator if f32 out)
        j = pl.program_id(1)
        nj = pl.num_programs(1)
        acc_ref = o_ref if acc_in_out else scratch[0]

        @pl.when(j == 0)
        def _():
            acc_ref[...] = jnp.zeros_like(acc_ref)

        if resident_weights:
            # Whole (chunked) weights live in VMEM; pick chunk j by a cheap
            # leading-axis dynamic index (no lane-dim dynamic slicing).
            w1 = w1_ref[j]
            b1 = b1_ref[j]
            w2 = w2_ref[j]
        else:
            # Streamed: BlockSpec already delivered chunk j.
            w1 = w1_ref[0]
            b1 = b1_ref[0]
            w2 = w2_ref[0]

        # First matmul: (tm, D) @ (D, ti) with f32 accumulation on the MXU.
        h = jnp.dot(x_ref[...], w1, preferred_element_type=jnp.float32)
        h = h + b1                               # bias add in f32
        g = _gelu_tanh(h.astype(gelu_dtype))     # bf16 GELU on v6e/v7x, f32 on v5e

        # Second matmul: (tm, ti) @ (ti, D), accumulated in f32 across j.
        acc_ref[...] += jnp.dot(g.astype(w2.dtype), w2,
                                preferred_element_type=jnp.float32)

        @pl.when(j == nj - 1)
        def _():
            # Fused epilogue: add c_proj bias (+ downcast if needed).
            o_ref[...] = (acc_ref[...] + b2_ref[...]).astype(o_ref.dtype)

    return kernel


def feed_forward(x, params, *, tm=None, resident_weights=None, gelu_in_bf16=None):
    """x: [B, S, D]; params from prepare_ffn_params."""
    w1c, b1c, w2c, b2c = params
    nj, D, ti = w1c.shape
    I = nj * ti
    assert w2c.shape == (nj, ti, D) and b1c.shape == (nj, 1, ti) and b2c.shape == (1, D)
    B, S, Dx = x.shape
    assert Dx == D

    kind, vmem_cap = _tpu_info()
    is_v7 = "v7" in kind
    is_v5 = "v5" in kind

    out_dtype = x.dtype
    acc_in_out = (out_dtype == jnp.float32)          # accumulate directly into o_ref
    mxu_dtype = w1c.dtype
    use_bf16 = (mxu_dtype == jnp.bfloat16)
    if gelu_in_bf16 is None:
        gelu_in_bf16 = use_bf16 and not is_v5        # bf16 VPU/EUP only on v6e/v7x
    gelu_dtype = jnp.bfloat16 if gelu_in_bf16 else jnp.float32

    # Flatten tokens; cast activation ONCE here (kernel never re-casts).
    x2 = x.reshape(B * S, D)
    if x2.dtype != mxu_dtype:
        x2 = x2.astype(mxu_dtype)
    M = x2.shape[0]

    # Sublane packing: 16 rows/vreg for bf16, 8 for f32.
    sublane = 16 if x2.dtype == jnp.bfloat16 else 8
    out_isz = jnp.dtype(out_dtype).itemsize
    w_isz = jnp.dtype(mxu_dtype).itemsize

    def _vmem_budget(tm_, resident):
        b = 2 * tm_ * D * (x2.dtype.itemsize + out_isz)     # pipelined x + out blocks
        b += 0 if acc_in_out else tm_ * D * 4                # f32 acc scratch
        b += 2 * tm_ * ti * 4                                # h / g temporaries (rough)
        wb = (w1c.size + w2c.size) * w_isz
        b += 2 * wb if resident else 2 * 2 * wb // nj        # resident vs streamed chunks
        return b

    # Resident weights on big-VMEM chips (v5e/v6e) when they fit; never on v7x.
    tm_est = max(sublane, _round_up(min(512, M), sublane))
    if resident_weights is None:
        resident_weights = (not is_v7) and \
            (_vmem_budget(tm_est, True) + (8 << 20) <= vmem_cap)

    # Token tile: v6e-like + streamed weights wants tm~1024 for arithmetic
    # intensity; v5e / v7x / resident-weight cases are compute-bound at 512.
    if tm is None:
        if is_v7 or is_v5 or resident_weights or M < 1024:
            tm_target = 512
        else:
            tm_target = 1024
    else:
        tm_target = tm
    # Ensure >=2 token-tile steps on v7x so both TensorCores get work.
    min_tiles = 2 if (is_v7 and M >= 2 * sublane) else 1
    tm_target = max(sublane, _round_up(min(tm_target, M), sublane))
    n_tiles = max(min_tiles, -(-M // tm_target))
    tm_blk = _round_up(-(-M // n_tiles), sublane)            # balanced -> low pad waste
    M_pad = _round_up(M, tm_blk)
    if M_pad != M:
        x2 = jnp.pad(x2, ((0, M_pad - M), (0, 0)))

    if resident_weights:
        w1_spec = pl.BlockSpec((nj, D, ti), lambda i, j: (0, 0, 0))
        b1_spec = pl.BlockSpec((nj, 1, ti), lambda i, j: (0, 0, 0))
        w2_spec = pl.BlockSpec((nj, ti, D), lambda i, j: (0, 0, 0))
        vmem_limit = min(max(_vmem_budget(tm_blk, True) + (16 << 20), 48 << 20),
                         vmem_cap - (4 << 20))
    else:
        w1_spec = pl.BlockSpec((1, D, ti), lambda i, j: (j, 0, 0))
        b1_spec = pl.BlockSpec((1, 1, ti), lambda i, j: (j, 0, 0))
        w2_spec = pl.BlockSpec((1, ti, D), lambda i, j: (j, 0, 0))
        vmem_limit = (48 << 20) if is_v7 else (64 << 20)

    kernel = _make_ffn_kernel(resident_weights=resident_weights,
                              acc_in_out=acc_in_out, gelu_dtype=gelu_dtype)
    scratch_shapes = [] if acc_in_out else [pltpu.VMEM((tm_blk, D), jnp.float32)]

    grid = (M_pad // tm_blk, nj)

    out = pl.pallas_call(
        kernel,
        out_shape=jax.ShapeDtypeStruct((M_pad, D), out_dtype),
        grid_spec=pltpu.PrefetchScalarGridSpec(
            num_scalar_prefetch=0,
            grid=grid,
            in_specs=[
                pl.BlockSpec((tm_blk, D), lambda i, j: (i, 0)),   # x tile (resident over j)
                w1_spec,
                b1_spec,
                w2_spec,
                pl.BlockSpec((1, D), lambda i, j: (0, 0)),        # b2
            ],
            out_specs=pl.BlockSpec((tm_blk, D), lambda i, j: (i, 0)),
            scratch_shapes=scratch_shapes,
        ),
        compiler_params=pltpu.CompilerParams(
            dimension_semantics=("parallel", "arbitrary"),
            vmem_limit_bytes=int(vmem_limit),
        ),
    )(x2, w1c, b1c, w2c, b2c)

    return out[:M].reshape(B, S, D)


def feed_forward_ref(x, w1, b1, w2, b2):
    h = jnp.einsum("bsd,di->bsi", x, w1) + b1
    g = _gelu_tanh(h)
    return jnp.einsum("bsi,id->bsd", g, w2) + b2


if __name__ == "__main__":
    # Small synthetic config (stand-in for GPTConfig(dim=1024, intermediate=4096)).
    B, S = 2, 8
    DIM, INTER = 128, 512

    key = jax.random.PRNGKey(0)
    kx, kw1, kb1, kw2, kb2 = jax.random.split(key, 5)

    x = jax.random.normal(kx, (B, S, DIM), dtype=jnp.float32)
    w1 = jax.random.normal(kw1, (DIM, INTER), dtype=jnp.float32) * (1.0 / DIM) ** 0.5
    b1 = jax.random.normal(kb1, (INTER,), dtype=jnp.float32) * 0.01
    w2 = jax.random.normal(kw2, (INTER, DIM), dtype=jnp.float32) * (1.0 / INTER) ** 0.5
    b2 = jax.random.normal(kb2, (DIM,), dtype=jnp.float32) * 0.01

    y_ref = feed_forward_ref(x, w1, b1, w2, b2)

    # 1) Exact f32 path, auto tiling / auto weight residency.
    p_f32 = prepare_ffn_params(w1, b1, w2, b2, use_bf16_matmul=False)
    y = jax.block_until_ready(feed_forward(x, p_f32))
    assert y.shape == (B, S, DIM)
    assert jnp.allclose(y, y_ref, atol=1e-4, rtol=1e-4), "f32 path mismatch"

    # 2) Exact f32 path, multi-step grid, STREAMED weights
    #    (exercises the j-accumulation and the streamed BlockSpecs).
    p_f32_c = prepare_ffn_params(w1, b1, w2, b2, use_bf16_matmul=False, ti=128)
    y = jax.block_until_ready(feed_forward(x, p_f32_c, tm=8, resident_weights=False))
    assert jnp.allclose(y, y_ref, atol=1e-4, rtol=1e-4), "streamed multi-chunk mismatch"

    # 3) Exact f32 path, multi-step grid, RESIDENT weights
    #    (exercises in-kernel dynamic chunk indexing).
    y = jax.block_until_ready(feed_forward(x, p_f32_c, tm=8, resident_weights=True))
    assert jnp.allclose(y, y_ref, atol=1e-4, rtol=1e-4), "resident multi-chunk mismatch"

    # 4) bf16 MXU path (weights stored in bf16 once; x cast once in wrapper).
    p_bf16 = prepare_ffn_params(w1, b1, w2, b2, use_bf16_matmul=True)
    y = jax.block_until_ready(feed_forward(x, p_bf16))
    assert y.shape == (B, S, DIM) and y.dtype == jnp.float32
    assert jnp.allclose(y, y_ref, atol=5e-2, rtol=5e-2), "bf16 path mismatch"

    # 5) bf16 activations in / bf16 out (exercises the f32-scratch epilogue).
    xb = x.astype(jnp.bfloat16)
    y = jax.block_until_ready(feed_forward(xb, p_bf16))
    assert y.dtype == jnp.bfloat16
    assert jnp.allclose(y.astype(jnp.float32), y_ref, atol=1e-1, rtol=1e-1), \
        "bf16-out path mismatch"

    print("KERNEL_OK")
</pallas_src>

<mosaic_0001>
module attributes {stable_mosaic.version = 11 : i64} {
  func.func @kernel(%arg0: i32, %arg1: i32, %arg2: memref<16x128xf32, #tpu.memory_space<vmem>>, %arg3: memref<1x128x512xf32, #tpu.memory_space<vmem>>, %arg4: memref<1x1x512xf32, #tpu.memory_space<vmem>>, %arg5: memref<1x512x128xf32, #tpu.memory_space<vmem>>, %arg6: memref<1x128xf32, #tpu.memory_space<vmem>>, %arg7: memref<16x128xf32, #tpu.memory_space<vmem>>) attributes {dimension_semantics = [#tpu.dimension_semantics<parallel>, #tpu.dimension_semantics<arbitrary>], iteration_bounds = array<i64: 1, 1>, scalar_prefetch = 0 : i64, scratch_operands = 0 : i64, tpu.core_type = #tpu.core_type<tc>, window_params = [{transform_indices = @transform_0, window_bounds = array<i64: 16, 128>}, {pipeline_mode = #tpu.pipeline_mode<synchronous>, transform_indices = @transform_1, window_bounds = array<i64: 1, 128, 512>}, {pipeline_mode = #tpu.pipeline_mode<synchronous>, transform_indices = @transform_2, window_bounds = array<i64: 1, 1, 512>}, {pipeline_mode = #tpu.pipeline_mode<synchronous>, transform_indices = @transform_3, window_bounds = array<i64: 1, 512, 128>}, {pipeline_mode = #tpu.pipeline_mode<synchronous>, transform_indices = @transform_4, window_bounds = array<i64: 1, 128>}, {transform_indices = @transform_5, window_bounds = array<i64: 16, 128>}]} {
    %c0_i32 = arith.constant 0 : i32
    %0 = arith.cmpi eq, %arg1, %c0_i32 : i32
    %1 = arith.extui %0 : i1 to i32
    %c0_i32_0 = arith.constant 0 : i32
    %2 = arith.cmpi ne, %1, %c0_i32_0 : i32
    scf.if %2 {
      %cst_19 = arith.constant 0.000000e+00 : f32
      %36 = vector.broadcast %cst_19 : f32 to vector<16x128xf32>
      %c0_20 = arith.constant 0 : index
      %c0_21 = arith.constant 0 : index
      %37 = vector.load %arg7[%c0_20, %c0_21] : memref<16x128xf32, #tpu.memory_space<vmem>>, vector<16x128xf32>
      tpu.vector_store %arg7[%c0_20, %c0_21], %36 {strides = array<i32>} : memref<16x128xf32, #tpu.memory_space<vmem>>, vector<16x128xf32>,
    } else {
    }
    %3 = arith.index_cast %arg1 : i32 to index
    %c0 = arith.constant 0 : index
    %c0_1 = arith.constant 0 : index
    %4 = vector.load %arg3[%3, %c0, %c0_1] : memref<1x128x512xf32, #tpu.memory_space<vmem>>, vector<1x128x512xf32>
    %5 = vector.shape_cast %4 : vector<1x128x512xf32> to vector<128x512xf32>
    %6 = arith.index_cast %arg1 : i32 to index
    %c0_2 = arith.constant 0 : index
    %c0_3 = arith.constant 0 : index
    %7 = vector.load %arg4[%6, %c0_2, %c0_3] : memref<1x1x512xf32, #tpu.memory_space<vmem>>, vector<1x1x512xf32>
    %8 = vector.shape_cast %7 : vector<1x1x512xf32> to vector<1x512xf32>
    %9 = arith.index_cast %arg1 : i32 to index
    %c0_4 = arith.constant 0 : index
    %c0_5 = arith.constant 0 : index
    %10 = vector.load %arg5[%9, %c0_4, %c0_5] : memref<1x512x128xf32, #tpu.memory_space<vmem>>, vector<1x512x128xf32>
    %11 = vector.shape_cast %10 : vector<1x512x128xf32> to vector<512x128xf32>
    %c0_6 = arith.constant 0 : index
    %c0_7 = arith.constant 0 : index
    %12 = vector.load %arg2[%c0_6, %c0_7] : memref<16x128xf32, #tpu.memory_space<vmem>>, vector<16x128xf32>
    %cst = arith.constant dense<0.000000e+00> : vector<16x512xf32>
    %13 = tpu.matmul %12, %5, %cst {dimension_numbers = #tpu.dot_dimension_numbers<[1], [0], [0], [1], [0, 0, 1, 1], [], []>} : vector<16x128xf32>, vector<128x512xf32>, vector<16x512xf32> -> vector<16x512xf32>
    %14 = vector.broadcast %8 : vector<1x512xf32> to vector<16x512xf32>
    %15 = arith.addf %13, %14 : vector<16x512xf32>
    %cst_8 = arith.constant 5.000000e-01 : f32
    %16 = vector.broadcast %cst_8 : f32 to vector<16x512xf32>
    %17 = arith.mulf %16, %15 : vector<16x512xf32>
    %cst_9 = arith.constant 4.471500e-02 : f32
    %18 = vector.broadcast %cst_9 : f32 to vector<16x512xf32>
    %19 = arith.mulf %18, %15 : vector<16x512xf32>
    %20 = arith.mulf %19, %15 : vector<16x512xf32>
    %21 = arith.mulf %20, %15 : vector<16x512xf32>
    %22 = arith.addf %15, %21 : vector<16x512xf32>
    %cst_10 = arith.constant 0.797884583 : f32
    %23 = vector.broadcast %cst_10 : f32 to vector<16x512xf32>
    %24 = arith.mulf %23, %22 : vector<16x512xf32>
    %25 = math.tanh %24 : vector<16x512xf32>
    %cst_11 = arith.constant 1.000000e+00 : f32
    %26 = vector.broadcast %cst_11 : f32 to vector<16x512xf32>
    %27 = arith.addf %26, %25 : vector<16x512xf32>
    %28 = arith.mulf %17, %27 : vector<16x512xf32>
    %c0_12 = arith.constant 0 : index
    %c0_13 = arith.constant 0 : index
    %29 = vector.load %arg7[%c0_12, %c0_13] : memref<16x128xf32, #tpu.memory_space<vmem>>, vector<16x128xf32>
    %cst_14 = arith.constant dense<0.000000e+00> : vector<16x128xf32>
    %30 = tpu.matmul %28, %11, %cst_14 {dimension_numbers = #tpu.dot_dimension_numbers<[1], [0], [0], [1], [0, 0, 1, 1], [], []>} : vector<16x512xf32>, vector<512x128xf32>, vector<16x128xf32> -> vector<16x128xf32>
    %31 = arith.addf %29, %30 : vector<16x128xf32>
    %c0_15 = arith.constant 0 : index
    %c0_16 = arith.constant 0 : index
    %32 = vector.load %arg7[%c0_15, %c0_16] : memref<16x128xf32, #tpu.memory_space<vmem>>, vector<16x128xf32>
    tpu.vector_store %arg7[%c0_15, %c0_16], %31 {strides = array<i32>} : memref<16x128xf32, #tpu.memory_space<vmem>>, vector<16x128xf32>,
    %c0_i32_17 = arith.constant 0 : i32
    %33 = arith.cmpi eq, %arg1, %c0_i32_17 : i32
    %34 = arith.extui %33 : i1 to i32
    %c0_i32_18 = arith.constant 0 : i32
    %35 = arith.cmpi ne, %34, %c0_i32_18 : i32
    scf.if %35 {
      %c0_19 = arith.constant 0 : index
      %c0_20 = arith.constant 0 : index
      %36 = vector.load %arg7[%c0_19, %c0_20] : memref<16x128xf32, #tpu.memory_space<vmem>>, vector<16x128xf32>
      %c0_21 = arith.constant 0 : index
      %c0_22 = arith.constant 0 : index
      %37 = vector.load %arg6[%c0_21, %c0_22] : memref<1x128xf32, #tpu.memory_space<vmem>>, vector<1x128xf32>
      %38 = vector.broadcast %37 : vector<1x128xf32> to vector<16x128xf32>
      %39 = arith.addf %36, %38 : vector<16x128xf32>
      %c0_23 = arith.constant 0 : index
      %c0_24 = arith.constant 0 : index
      %40 = vector.load %arg7[%c0_23, %c0_24] : memref<16x128xf32, #tpu.memory_space<vmem>>, vector<16x128xf32>
      tpu.vector_store %arg7[%c0_23, %c0_24], %39 {strides = array<i32>} : memref<16x128xf32, #tpu.memory_space<vmem>>, vector<16x128xf32>,
    } else {
    }
    return
  }
  func.func @transform_0(%arg0: i32, %arg1: i32) -> (i32, i32) {
    %c0_i32 = arith.constant 0 : i32
    %c0_i32_0 = arith.constant 0 : i32
    return %arg0, %c0_i32 : i32, i32
  }
  func.func @transform_1(%arg0: i32, %arg1: i32) -> (i32, i32, i32) {
    %c0_i32 = arith.constant 0 : i32
    %c0_i32_0 = arith.constant 0 : i32
    %c0_i32_1 = arith.constant 0 : i32
    %c0_i32_2 = arith.constant 0 : i32
    return %c0_i32, %c0_i32_0, %c0_i32_1 : i32, i32, i32
  }
  func.func @transform_2(%arg0: i32, %arg1: i32) -> (i32, i32, i32) {
    %c0_i32 = arith.constant 0 : i32
    %c0_i32_0 = arith.constant 0 : i32
    %c0_i32_1 = arith.constant 0 : i32
    %c0_i32_2 = arith.constant 0 : i32
    return %c0_i32, %c0_i32_0, %c0_i32_1 : i32, i32, i32
  }
  func.func @transform_3(%arg0: i32, %arg1: i32) -> (i32, i32, i32) {
    %c0_i32 = arith.constant 0 : i32
    %c0_i32_0 = arith.constant 0 : i32
    %c0_i32_1 = arith.constant 0 : i32
    %c0_i32_2 = arith.constant 0 : i32
    return %c0_i32, %c0_i32_0, %c0_i32_1 : i32, i32, i32
  }
  func.func @transform_4(%arg0: i32, %arg1: i32) -> (i32, i32) {
    %c0_i32 = arith.constant 0 : i32
    %c0_i32_0 = arith.constant 0 : i32
    %c0_i32_1 = arith.constant 0 : i32
    return %c0_i32, %c0_i32_0 : i32, i32
  }
  func.func @transform_5(%arg0: i32, %arg1: i32) -> (i32, i32) {
    %c0_i32 = arith.constant 0 : i32
    %c0_i32_0 = arith.constant 0 : i32
    return %arg0, %c0_i32 : i32, i32
  }
}

</mosaic_0001>

<bundles_post_ra>
// kernel: tpu_custom_call.1
= control target key start
LH: loop header
LB: loop body
LE: loop exit
PB: predicated region body
PF: predicated region fallthrough
CT: control target
= control target key end

     0   :  { %10 = vsyncpa [#allocation3], 0  ;;  %s1108_s0 = inlined_call_operand.hbm [shape: f32[16,128], index: 0, kind: input, shape index: {}]   ;;  %s1109_s1 = inlined_call_operand.hbm [shape: f32[1,128,512], index: 1, kind: input, shape index: {}]   ;;  %s1110_s2 = inlined_call_operand.vmem [shape: f32[1,1,512], index: 2, kind: input, shape index: {}]   ;;  %s1111_s3 = inlined_call_operand.hbm [shape: f32[1,512,128], index: 3, kind: input, shape index: {}]   ;;  %s1112_s4 = inlined_call_operand.vmem [shape: f32[1,128], index: 4, kind: input, shape index: {}]   ;;  %s1113_s5 = inlined_call_operand.hbm [shape: f32[16,128], index: 5, kind: output, shape index: {}]  }
   0x1   :  { %11 = vsyncpa [#allocation6], 0 }
   0x2   :  { %12 = vsyncpa [#allocation4], 0  ;;  %s967_s18 = smov [#allocation5]   ;;  %s873_s22 = scalar_lea.hbm %s1109_s1, 8192 }
   0x3   :  { %s30_s19 = sshll.u32 %s967_s18, 4  ;;  %p874_p0 = scmp.ne.s32.totalorder %s1109_s1, %s873_s22  ;;  %s31_s19 = int_to_ptr.vmem [resolvable:$true] %s30_s19 }
   0x4   :  { %p877_p1 = scmp.lt.u32.totalorder %s873_s22, %s1109_s1 }
   0x6   :  { %p879_p2 = pnand %p877_p1, %p874_p0 }
   0x8   :  { %882 = shalt.err (!%p879_p2)
}
   0x9   :  { %s883_s27 = scalar_lea.vmem %s31_s19, 8192  ;;  %p888_p4 = scmp.lt.s32.totalorder %s31_s19, %s31_s19 }
   0xa   :  { %p884_p3 = scmp.ne.s32.totalorder %s31_s19, %s883_s27  ;;  %p889_p5 = scmp.lt.s32.totalorder %s883_s27, %s883_s27 }
   0xc   :  { %p890_p6 = por %p889_p5, %p888_p4 }
   0xe   :  { %p891_p7 = pnand %p890_p6, %p884_p3 }
  0x10   :  { %894 = shalt.err (!%p891_p7)
}
  0x11   :  { %s968_s28 = smov 512   ;;  %s969_s29 = smov 32  }
  0x12   :  { %36 = dma.hbm_to_vmem [thread:$0]  %s1109_s1, 8192, %s31_s19, [#allocation6], %s968_s28, %s968_s28, %s969_s29  }
  0x13   :  { %s970_s7 = smov [#allocation2]   ;;  %s895_s11 = scalar_lea.hbm %s1108_s0, 256 }
  0x14   :  { %s18_s8 = sshll.u32 %s970_s7, 4  ;;  %p896_p8 = scmp.ne.s32.totalorder %s1108_s0, %s895_s11  ;;  %s19_s8 = int_to_ptr.vmem [resolvable:$true] %s18_s8 }
  0x15   :  { %p899_p9 = scmp.lt.u32.totalorder %s895_s11, %s1108_s0 }
  0x17   :  { %p901_p10 = pnand %p899_p9, %p896_p8 }
  0x19   :  { %904 = shalt.err (!%p901_p10)
}
  0x1a   :  { %s905_s16 = scalar_lea.vmem %s19_s8, 256  ;;  %p910_p12 = scmp.lt.s32.totalorder %s19_s8, %s19_s8 }
  0x1b   :  { %p906_p11 = scmp.ne.s32.totalorder %s19_s8, %s905_s16  ;;  %p911_p13 = scmp.lt.s32.totalorder %s905_s16, %s905_s16 }
  0x1d   :  { %p912_p0 = por %p911_p13, %p910_p12 }
  0x1f   :  { %p913_p1 = pnand %p912_p0, %p906_p11 }
  0x21   :  { %916 = shalt.err (!%p913_p1)
}
  0x22   :  { %s971_s1 = smov 128   ;;  %s972_s17 = smov 8  }
  0x23   :  { %24 = dma.hbm_to_vmem [thread:$0]  %s1108_s0, 256, %s19_s8, [#allocation3], %s971_s1, %s971_s1, %s972_s17  }
  0x24   :  { %s973_s20 = smov [#allocation7]   ;;  %s917_s24 = scalar_lea.hbm %s1111_s3, 8192 }
  0x25   :  { %s44_s21 = sshll.u32 %s973_s20, 4  ;;  %p918_p2 = scmp.ne.s32.totalorder %s1111_s3, %s917_s24  ;;  %s45_s21 = int_to_ptr.vmem [resolvable:$true] %s44_s21 }
  0x26   :  { %p921_p3 = scmp.lt.u32.totalorder %s917_s24, %s1111_s3 }
  0x28   :  { %p923_p4 = pnand %p921_p3, %p918_p2 }
  0x2a   :  { %926 = shalt.err (!%p923_p4)
}
  0x2b   :  { %s927_s29 = scalar_lea.vmem %s45_s21, 8192  ;;  %p932_p6 = scmp.lt.s32.totalorder %s45_s21, %s45_s21 }
  0x2c   :  { %p928_p5 = scmp.ne.s32.totalorder %s45_s21, %s927_s29  ;;  %p933_p7 = scmp.lt.s32.totalorder %s927_s29, %s927_s29 }
  0x2e   :  { %p934_p8 = por %p933_p7, %p932_p6 }
  0x30   :  { %p935_p9 = pnand %p934_p8, %p928_p5 }
  0x32   :  { %938 = shalt.err (!%p935_p9)
}
  0x33   :  { %50 = dma.hbm_to_vmem [thread:$0]  %s1111_s3, 8192, %s45_s21, [#allocation6], %s971_s1, %s971_s1, %s972_s17  }
  0x34   :  { %961 = dma.done.wait [#allocation3], 256  }
  0x35   :  { %962 = vsyncadd [#allocation3], 4294967040 }
  0x36   :  { %963 = dma.done.wait [#allocation6], 16384  }
  0x37   :  { %964 = vsyncadd [#allocation6], 4294950912  ;;  %v974_v0 = vmov 0.0   ;;  %v72_v1 = vld [vmem:[#allocation5 + $0x8] sm:$0xff]  ;;  %v74_v3 = vld [vmem:[#allocation5 + $0x18] sm:$0xff]  ;;  %s975_s8 = smov [#allocation8]  }
  0x38   :  { %291 = vmatprep.mubr.f32.mxu0 %v974_v0  ;;  %368 = vmatprep.mubr.f32.mxu1 %v974_v0  ;;  %v76_v2 = vld [vmem:[#allocation5 + $0x28] sm:$0xff]  ;;  %v78_v5 = vld [vmem:[#allocation5 + $0x38] sm:$0xff]  ;;  %v71_v6 = vld [vmem:[#allocation5] sm:$0xff]  ;;  %s630_s9 = sshll.u32 %s975_s8, 4  ;;  %s631_s9 = int_to_ptr.vmem [resolvable:$true] %s630_s9 }
  0x39   :  { %v720_v4 = vpack.c.bf16 %v76_v2, %v72_v1  ;;  %v75_v7 = vld [vmem:[#allocation5 + $0x20] sm:$0xff]  ;;  %v752_v8 = vpack.c.bf16 %v78_v5, %v74_v3  ;;  %v73_v10 = vld [vmem:[#allocation5 + $0x10] sm:$0xff]  ;;  %v80_v12 = vld [vmem:[#allocation5 + $0x48] sm:$0xff]  ;;  %s939_s10 = scalar_lea.vmem %s631_s9, 256  ;;  %p944_p11 = scmp.lt.s32.totalorder %s631_s9, %s631_s9 }
  0x3a   :  { %v722_v9 = vpack.c.bf16 %v75_v7, %v71_v6  ;;  %v77_v11 = vld [vmem:[#allocation5 + $0x30] sm:$0xff]  ;;  %v84_v14 = vld [vmem:[#allocation5 + $0x68] sm:$0xff]  ;;  %v82_v15 = vld [vmem:[#allocation5 + $0x58] sm:$0xff]  ;;  %p940_p10 = scmp.ne.s32.totalorder %s631_s9, %s939_s10  ;;  %p945_p12 = scmp.lt.s32.totalorder %s939_s10, %s939_s10 }
  0x3b   :  { %721 = vmatprep.subr.bf16.mxu0 %v720_v4  ;;  %v754_v13 = vpack.c.bf16 %v77_v11, %v73_v10  ;;  %v86_v16 = vld [vmem:[#allocation5 + $0x78] sm:$0xff]  ;;  %753 = vmatprep.subr.bf16.mxu1 %v752_v8  ;;  %v724_v17 = vpack.c.bf16 %v84_v14, %v80_v12  ;;  %v79_v19 = vld [vmem:[#allocation5 + $0x40] sm:$0xff]  ;;  %v81_v21 = vld [vmem:[#allocation5 + $0x50] sm:$0xff] }
  0x3c   :  { %723 = vmatpush1.bf16.msra.mxu0 %v722_v9  ;;  %v756_v18 = vpack.c.bf16 %v86_v16, %v82_v15  ;;  %v83_v20 = vld [vmem:[#allocation5 + $0x60] sm:$0xff]  ;;  %v85_v23 = vld [vmem:[#allocation5 + $0x70] sm:$0xff]  ;;  %v88_v24 = vld [vmem:[#allocation5 + $0x88] sm:$0xff]  ;;  %p946_p13 = por %p945_p12, %p944_p11 }
  0x3d   :  { %755 = vmatpush1.bf16.msra.mxu1 %v754_v13  ;;  %v726_v22 = vpack.c.bf16 %v83_v20, %v79_v19  ;;  %v92_v25 = vld [vmem:[#allocation5 + $0xa8] sm:$0xff]  ;;  %725 = vmatprep.subr.bf16.mxu0 %v724_v17  ;;  %v758_v26 = vpack.c.bf16 %v85_v23, %v81_v21  ;;  %v90_v28 = vld [vmem:[#allocation5 + $0x98] sm:$0xff]  ;;  %v87_v30 = vld [vmem:[#allocation5 + $0x80] sm:$0xff] }
  0x3e   :  { %757 = vmatprep.subr.bf16.mxu1 %v756_v18  ;;  %v728_v27 = vpack.c.bf16 %v92_v25, %v88_v24  ;;  %v94_v29 = vld [vmem:[#allocation5 + $0xb8] sm:$0xff]  ;;  %v91_v32 = vld [vmem:[#allocation5 + $0xa0] sm:$0xff]  ;;  %v89_v33 = vld [vmem:[#allocation5 + $0x90] sm:$0xff]  ;;  %p947_p0 = pnand %p946_p13, %p940_p10 }
  0x3f   :  { %v760_v31 = vpack.c.bf16 %v94_v29, %v90_v28  ;;  %v93_v34 = vld [vmem:[#allocation5 + $0xb0] sm:$0xff]  ;;  %v730_v35 = vpack.c.bf16 %v91_v32, %v87_v30  ;;  %v96_v36 = vld [vmem:[#allocation5 + $0xc8] sm:$0xff]  ;;  %v98_v38 = vld [vmem:[#allocation5 + $0xd8] sm:$0xff] }
  0x40   :  { %727 = vmatpush1.bf16.msra.mxu0 %v726_v22  ;;  %v100_v37 = vld [vmem:[#allocation5 + $0xe8] sm:$0xff]  ;;  %v762_v39 = vpack.c.bf16 %v93_v34, %v89_v33  ;;  %v102_v41 = vld [vmem:[#allocation5 + $0xf8] sm:$0xff]  ;;  %v95_v42 = vld [vmem:[#allocation5 + $0xc0] sm:$0xff] }
  0x41   :  { %759 = vmatpush1.bf16.msra.mxu1 %v758_v26  ;;  %729 = vmatprep.subr.bf16.mxu0 %v728_v27  ;;  %v732_v40 = vpack.c.bf16 %v100_v37, %v96_v36  ;;  %v99_v43 = vld [vmem:[#allocation5 + $0xe0] sm:$0xff]  ;;  %v764_v44 = vpack.c.bf16 %v102_v41, %v98_v38  ;;  %v97_v45 = vld [vmem:[#allocation5 + $0xd0] sm:$0xff]  ;;  %v104_v47 = vld [vmem:[#allocation5 + $0x108] sm:$0xff] }
  0x42   :  { %761 = vmatprep.subr.bf16.mxu1 %v760_v31  ;;  %v101_v46 = vld [vmem:[#allocation5 + $0xf0] sm:$0xff]  ;;  %v108_v48 = vld [vmem:[#allocation5 + $0x128] sm:$0xff]  ;;  %v106_v49 = vld [vmem:[#allocation5 + $0x118] sm:$0xff]  ;;  %v734_v51 = vpack.c.bf16 %v99_v43, %v95_v42 }
  0x43   :  { %v110_v50 = vld [vmem:[#allocation5 + $0x138] sm:$0xff]  ;;  %v766_v52 = vpack.c.bf16 %v101_v46, %v97_v45  ;;  %v736_v53 = vpack.c.bf16 %v108_v48, %v104_v47  ;;  %v103_v54 = vld [vmem:[#allocation5 + $0x100] sm:$0xff]  ;;  %v105_v56 = vld [vmem:[#allocation5 + $0x110] sm:$0xff] }
  0x44   :  { %731 = vmatpush1.bf16.msra.mxu0 %v730_v35  ;;  %v107_v55 = vld [vmem:[#allocation5 + $0x120] sm:$0xff]  ;;  %v768_v57 = vpack.c.bf16 %v110_v50, %v106_v49  ;;  %v109_v58 = vld [vmem:[#allocation5 + $0x130] sm:$0xff]  ;;  %v112_v59 = vld [vmem:[#allocation5 + $0x148] sm:$0xff] }
  0x45   :  { %763 = vmatpush1.bf16.msra.mxu1 %v762_v39  ;;  %733 = vmatprep.subr.bf16.mxu0 %v732_v40  ;;  %v116_v60 = vld [vmem:[#allocation5 + $0x168] sm:$0xff]  ;;  %v114_v61 = vld [vmem:[#allocation5 + $0x158] sm:$0xff]  ;;  %v738_v63 = vpack.c.bf16 %v107_v55, %v103_v54  ;;  %v770_v1 = vpack.c.bf16 %v109_v58, %v105_v56  ;;  %v111_v3 = vld [vmem:[#allocation5 + $0x140] sm:$0xff] }
  0x46   :  { %765 = vmatprep.subr.bf16.mxu1 %v764_v44  ;;  %v118_v62 = vld [vmem:[#allocation5 + $0x178] sm:$0xff]  ;;  %v740_v2 = vpack.c.bf16 %v116_v60, %v112_v59  ;;  %v115_v4 = vld [vmem:[#allocation5 + $0x160] sm:$0xff]  ;;  %v113_v5 = vld [vmem:[#allocation5 + $0x150] sm:$0xff] }
  0x47   :  { %v772_v6 = vpack.c.bf16 %v118_v62, %v114_v61  ;;  %v117_v7 = vld [vmem:[#allocation5 + $0x170] sm:$0xff]  ;;  %v120_v8 = vld [vmem:[#allocation5 + $0x188] sm:$0xff]  ;;  %v122_v10 = vld [vmem:[#allocation5 + $0x198] sm:$0xff]  ;;  %v742_v12 = vpack.c.bf16 %v115_v4, %v111_v3 }
  0x48   :  { %735 = vmatpush1.bf16.msra.mxu0 %v734_v51  ;;  %v124_v9 = vld [vmem:[#allocation5 + $0x1a8] sm:$0xff]  ;;  %v126_v11 = vld [vmem:[#allocation5 + $0x1b8] sm:$0xff]  ;;  %v774_v13 = vpack.c.bf16 %v117_v7, %v113_v5  ;;  %v119_v15 = vld [vmem:[#allocation5 + $0x180] sm:$0xff] }
  0x49   :  { %767 = vmatpush1.bf16.msra.mxu1 %v766_v52  ;;  %737 = vmatprep.subr.bf16.mxu0 %v736_v53  ;;  %v744_v14 = vpack.c.bf16 %v124_v9, %v120_v8  ;;  %v123_v16 = vld [vmem:[#allocation5 + $0x1a0] sm:$0xff]  ;;  %v121_v17 = vld [vmem:[#allocation5 + $0x190] sm:$0xff]  ;;  %v776_v18 = vpack.c.bf16 %v126_v11, %v122_v10  ;;  %v128_v20 = vld [vmem:[#allocation5 + $0x1c8] sm:$0xff] }
  0x4a   :  { %769 = vmatprep.subr.bf16.mxu1 %v768_v57  ;;  %v125_v19 = vld [vmem:[#allocation5 + $0x1b0] sm:$0xff]  ;;  %v132_v21 = vld [vmem:[#allocation5 + $0x1e8] sm:$0xff]  ;;  %v130_v22 = vld [vmem:[#allocation5 + $0x1d8] sm:$0xff]  ;;  %v746_v24 = vpack.c.bf16 %v123_v16, %v119_v15 }
  0x4b   :  { %v134_v23 = vld [vmem:[#allocation5 + $0x1f8] sm:$0xff]  ;;  %v778_v25 = vpack.c.bf16 %v125_v19, %v121_v17  ;;  %v748_v26 = vpack.c.bf16 %v132_v21, %v128_v20  ;;  %v127_v27 = vld [vmem:[#allocation5 + $0x1c0] sm:$0xff]  ;;  %v129_v29 = vld [vmem:[#allocation5 + $0x1d0] sm:$0xff] }
  0x4c   :  { %739 = vmatpush1.bf16.msra.mxu0 %v738_v63  ;;  %v131_v28 = vld [vmem:[#allocation5 + $0x1e0] sm:$0xff]  ;;  %v780_v30 = vpack.c.bf16 %v134_v23, %v130_v22  ;;  %v133_v31 = vld [vmem:[#allocation5 + $0x1f0] sm:$0xff]  ;;  %v157_v33 = vld [vmem:[#allocation7 + $0x88] sm:$0xff] }
  0x4d   :  { %771 = vmatpush1.bf16.msra.mxu1 %v770_v1  ;;  %741 = vmatprep.subr.bf16.mxu0 %v740_v2  ;;  %v156_v32 = vld [vmem:[#allocation7 + $0x80] sm:$0xff]  ;;  %v189_v35 = vld [vmem:[#allocation7 + $0x188] sm:$0xff]  ;;  %v750_v36 = vpack.c.bf16 %v131_v28, %v127_v27  ;;  %v782_v37 = vpack.c.bf16 %v133_v31, %v129_v29  ;;  %v204_v44 = vld [vmem:[#allocation2] sm:$0xff] }
  0x4e   :  { %773 = vmatprep.subr.bf16.mxu1 %v772_v6  ;;  %v188_v34 = vld [vmem:[#allocation7 + $0x180] sm:$0xff]  ;;  %v784_v38 = vpack.c.bf16 %v157_v33, %v156_v32  ;;  %v141_v41 = vld [vmem:[#allocation7 + $0x8] sm:$0xff]  ;;  %v205_v47 = vld [vmem:[#allocation2 + $0x8] sm:$0xff] }
  0x4f   :  { %v816_v39 = vpack.c.bf16 %v189_v35, %v188_v34  ;;  %v140_v40 = vld [vmem:[#allocation7] sm:$0xff]  ;;  %v173_v43 = vld [vmem:[#allocation7 + $0x108] sm:$0xff]  ;;  %v158_v48 = vld [vmem:[#allocation7 + $0x90] sm:$0xff] }
  0x50   :  { %743 = vmatpush1.bf16.msra.mxu0 %v742_v12  ;;  %v172_v42 = vld [vmem:[#allocation7 + $0x100] sm:$0xff]  ;;  %v786_v45 = vpack.c.bf16 %v141_v41, %v140_v40  ;;  %v159_v49 = vld [vmem:[#allocation7 + $0x98] sm:$0xff]  ;;  %v190_v50 = vld [vmem:[#allocation7 + $0x190] sm:$0xff] }
  0x51   :  { %775 = vmatpush1.bf16.msra.mxu1 %v774_v13  ;;  %745 = vmatprep.subr.bf16.mxu0 %v744_v14  ;;  %v818_v46 = vpack.c.bf16 %v173_v43, %v172_v42  ;;  %v788_v51 = vpack.c.bf16 %v159_v49, %v158_v48  ;;  %v191_v52 = vld [vmem:[#allocation7 + $0x198] sm:$0xff]  ;;  %v142_v53 = vld [vmem:[#allocation7 + $0x10] sm:$0xff]  ;;  %v161_v60 = vld [vmem:[#allocation7 + $0xa8] sm:$0xff] }
  0x52   :  { %777 = vmatprep.subr.bf16.mxu1 %v776_v18  ;;  %v143_v54 = vld [vmem:[#allocation7 + $0x18] sm:$0xff]  ;;  %v820_v55 = vpack.c.bf16 %v191_v52, %v190_v50  ;;  %v174_v57 = vld [vmem:[#allocation7 + $0x110] sm:$0xff]  ;;  %v192_v61 = vld [vmem:[#allocation7 + $0x1a0] sm:$0xff] }
  0x53   :  { %v790_v56 = vpack.c.bf16 %v143_v54, %v142_v53  ;;  %v175_v58 = vld [vmem:[#allocation7 + $0x118] sm:$0xff]  ;;  %v193_v63 = vld [vmem:[#allocation7 + $0x1a8] sm:$0xff]  ;;  %v144_v1 = vld [vmem:[#allocation7 + $0x20] sm:$0xff] }
  0x54   :  { %747 = vmatpush1.bf16.msra.mxu0 %v746_v24  ;;  %v822_v59 = vpack.c.bf16 %v175_v58, %v174_v57  ;;  %v145_v2 = vld [vmem:[#allocation7 + $0x28] sm:$0xff]  ;;  %v824_v3 = vpack.c.bf16 %v193_v63, %v192_v61  ;;  %v176_v5 = vld [vmem:[#allocation7 + $0x120] sm:$0xff]  ;;  %v162_v8 = vld [vmem:[#allocation7 + $0xb0] sm:$0xff] }
  0x55   :  { %779 = vmatpush1.bf16.msra.mxu1 %v778_v25  ;;  %749 = vmatprep.subr.bf16.mxu0 %v748_v26  ;;  %v794_v4 = vpack.c.bf16 %v145_v2, %v144_v1  ;;  %v177_v6 = vld [vmem:[#allocation7 + $0x128] sm:$0xff]  ;;  %v163_v9 = vld [vmem:[#allocation7 + $0xb8] sm:$0xff]  ;;  %v194_v10 = vld [vmem:[#allocation7 + $0x1b0] sm:$0xff] }
  0x56   :  { %781 = vmatprep.subr.bf16.mxu1 %v780_v30  ;;  %v826_v7 = vpack.c.bf16 %v177_v6, %v176_v5  ;;  %v796_v11 = vpack.c.bf16 %v163_v9, %v162_v8  ;;  %v195_v12 = vld [vmem:[#allocation7 + $0x1b8] sm:$0xff]  ;;  %v146_v13 = vld [vmem:[#allocation7 + $0x30] sm:$0xff]  ;;  %v164_v20 = vld [vmem:[#allocation7 + $0xc0] sm:$0xff] }
  0x57   :  { %v147_v14 = vld [vmem:[#allocation7 + $0x38] sm:$0xff]  ;;  %v828_v15 = vpack.c.bf16 %v195_v12, %v194_v10  ;;  %v178_v17 = vld [vmem:[#allocation7 + $0x130] sm:$0xff]  ;;  %v165_v21 = vld [vmem:[#allocation7 + $0xc8] sm:$0xff] }
  0x58   :  { %751 = vmatpush1.bf16.msra.mxu0 %v750_v36  ;;  %v798_v16 = vpack.c.bf16 %v147_v14, %v146_v13  ;;  %v179_v18 = vld [vmem:[#allocation7 + $0x138] sm:$0xff]  ;;  %v196_v22 = vld [vmem:[#allocation7 + $0x1c0] sm:$0xff]  ;;  %v800_v23 = vpack.c.bf16 %v165_v21, %v164_v20  ;;  %v197_v24 = vld [vmem:[#allocation7 + $0x1c8] sm:$0xff] }
  0x59   :  { %783 = vmatpush1.bf16.msra.mxu1 %v782_v37  ;;  %785 = vmatprep.subr.bf16.mxu0 %v784_v38  ;;  %v830_v19 = vpack.c.bf16 %v179_v18, %v178_v17  ;;  %v148_v25 = vld [vmem:[#allocation7 + $0x40] sm:$0xff]  ;;  %v149_v26 = vld [vmem:[#allocation7 + $0x48] sm:$0xff]  ;;  %v832_v27 = vpack.c.bf16 %v197_v24, %v196_v22  ;;  %v166_v31 = vld [vmem:[#allocation7 + $0xd0] sm:$0xff] }
  0x5a   :  { %817 = vmatprep.subr.bf16.mxu1 %v816_v39  ;;  %v802_v28 = vpack.c.bf16 %v149_v26, %v148_v25  ;;  %v180_v29 = vld [vmem:[#allocation7 + $0x140] sm:$0xff]  ;;  %v181_v30 = vld [vmem:[#allocation7 + $0x148] sm:$0xff]  ;;  %v167_v33 = vld [vmem:[#allocation7 + $0xd8] sm:$0xff] }
  0x5b   :  { %292 = vmatmul.mubr.f32.vlgmr.msra.gmra.mrb[0].mxu0 %v204_v44  ;;  %v834_v32 = vpack.c.bf16 %v181_v30, %v180_v29  ;;  %v198_v34 = vld [vmem:[#allocation7 + $0x1d0] sm:$0xff]  ;;  %v199_v35 = vld [vmem:[#allocation7 + $0x1d8] sm:$0xff]  ;;  %v804_v36 = vpack.c.bf16 %v167_v33, %v166_v31  ;;  %v168_v43 = vld [vmem:[#allocation7 + $0xe0] sm:$0xff] }
  0x5c   :  { %369 = vmatmul.mubr.f32.vlgmr.msra.gmra.mrb[0].mxu1 %v204_v44  ;;  %297 = vmatprep.mubr.f32.mxu0 %v974_v0  ;;  %v836_v37 = vpack.c.bf16 %v199_v35, %v198_v34  ;;  %v150_v38 = vld [vmem:[#allocation7 + $0x50] sm:$0xff]  ;;  %v151_v39 = vld [vmem:[#allocation7 + $0x58] sm:$0xff]  ;;  %v169_v44 = vld [vmem:[#allocation7 + $0xe8] sm:$0xff] }
  0x5d   :  { %374 = vmatprep.mubr.f32.mxu1 %v974_v0  ;;  %787 = vmatpush3.bf16.msra.mxu0 %v786_v45  ;;  %v160_v0 = vld [vmem:[#allocation7 + $0xa0] sm:$0xff]  ;;  %v182_v40 = vld [vmem:[#allocation7 + $0x150] sm:$0xff]  ;;  %v806_v41 = vpack.c.bf16 %v151_v39, %v150_v38  ;;  %v183_v42 = vld [vmem:[#allocation7 + $0x158] sm:$0xff] }
  0x5e   :  { %819 = vmatpush3.bf16.msra.mxu1 %v818_v46  ;;  %789 = vmatprep.subr.bf16.mxu0 %v788_v51  ;;  %v792_v62 = vpack.c.bf16 %v161_v60, %v160_v0  ;;  %v838_v45 = vpack.c.bf16 %v183_v42, %v182_v40  ;;  %v808_v46 = vpack.c.bf16 %v169_v44, %v168_v43  ;;  %v201_v48 = vld [vmem:[#allocation7 + $0x1e8] sm:$0xff]  ;;  %v152_v49 = vld [vmem:[#allocation7 + $0x60] sm:$0xff]  ;;  %v202_v57 = vld [vmem:[#allocation7 + $0x1f0] sm:$0xff] }
  0x5f   :  { %298 = vmatmul.mubr.f32.gmra.mrb[2].mxu0 %v205_v47  ;;  %821 = vmatprep.subr.bf16.mxu1 %v820_v55  ;;  %v153_v51 = vld [vmem:[#allocation7 + $0x68] sm:$0xff]  ;;  %v184_v52 = vld [vmem:[#allocation7 + $0x160] sm:$0xff]  ;;  %v170_v55 = vld [vmem:[#allocation7 + $0xf0] sm:$0xff] }
  0x60   :  { %375 = vmatmul.mubr.f32.gmra.mrb[2].mxu1 %v205_v47  ;;  %v200_v47 = vld [vmem:[#allocation7 + $0x1e0] sm:$0xff]  ;;  %v185_v53 = vld [vmem:[#allocation7 + $0x168] sm:$0xff]  ;;  %v810_v54 = vpack.c.bf16 %v153_v51, %v152_v49  ;;  %v203_v0 = vld [vmem:[#allocation7 + $0x1f8] sm:$0xff] }
  0x61   :  { %791 = vmatpush3.bf16.msra.mxu0 %v790_v56  ;;  %v840_v50 = vpack.c.bf16 %v201_v48, %v200_v47  ;;  %v171_v56 = vld [vmem:[#allocation7 + $0xf8] sm:$0xff]  ;;  %v842_v58 = vpack.c.bf16 %v185_v53, %v184_v52  ;;  %v154_v60 = vld [vmem:[#allocation7 + $0x70] sm:$0xff] }
  0x62   :  { %823 = vmatpush3.bf16.msra.mxu1 %v822_v59  ;;  %793 = vmatprep.subr.bf16.mxu0 %v792_v62  ;;  %v812_v59 = vpack.c.bf16 %v171_v56, %v170_v55  ;;  %v155_v61 = vld [vmem:[#allocation7 + $0x78] sm:$0xff]  ;;  %v844_v62 = vpack.c.bf16 %v203_v0, %v202_v57  ;;  %v186_v63 = vld [vmem:[#allocation7 + $0x170] sm:$0xff] }
  0x63   :  { %825 = vmatprep.subr.bf16.mxu1 %v824_v3  ;;  %v187_v1 = vld [vmem:[#allocation7 + $0x178] sm:$0xff]  ;;  %v814_v2 = vpack.c.bf16 %v155_v61, %v154_v60 }
  0x64   :  { %v846_v3 = vpack.c.bf16 %v187_v1, %v186_v63 }
  0x65   :  { %795 = vmatpush3.bf16.msra.mxu0 %v794_v4  ;;  %v207_v4 = vlaneseq }
  0x66   :  { %827 = vmatpush3.bf16.msra.mxu1 %v826_v7  ;;  %797 = vmatprep.subr.bf16.mxu0 %v796_v11  ;;  %v137_v7 = vld [vmem:[%s1110_s2] sm:$0xf] }
  0x67   :  { %829 = vmatprep.subr.bf16.mxu1 %v828_v15  ;;  %v208_v5 = vshrl.u32 %v207_v4, 7 }
  0x69   :  { %799 = vmatpush3.bf16.msra.mxu0 %v798_v16  ;;  %v209_v6 = vsub.s32 0, %v208_v5  ;;  %v217_v8 = vsub.s32 2, %v208_v5  ;;  %v213_v9 = vsub.s32 1, %v208_v5  ;;  %v221_v10 = vsub.s32 3, %v208_v5 }
  0x6a   :  { %831 = vmatpush3.bf16.msra.mxu1 %v830_v19  ;;  %801 = vmatprep.subr.bf16.mxu0 %v800_v23 }
  0x6b   :  { %833 = vmatprep.subr.bf16.mxu1 %v832_v27  ;;  %v210_v11 = vrot.slane %v137_v7, %v209_v6  ;;  %v218_v12 = vrot.slane %v137_v7, %v217_v8  ;;  %v214_v13 = vrot.slane %v137_v7, %v213_v9  ;;  %v222_v14 = vrot.slane %v137_v7, %v221_v10 }
  0x6d   :  { %803 = vmatpush3.bf16.msra.mxu0 %v802_v28 }
  0x6e   :  { %835 = vmatpush3.bf16.msra.mxu1 %v834_v32  ;;  %805 = vmatprep.subr.bf16.mxu0 %v804_v36 }
  0x6f   :  { %837 = vmatprep.subr.bf16.mxu1 %v836_v37 }
  0x71   :  { %807 = vmatpush3.bf16.msra.mxu0 %v806_v41 }
  0x72   :  { %839 = vmatpush3.bf16.msra.mxu1 %v838_v45  ;;  %809 = vmatprep.subr.bf16.mxu0 %v808_v46 }
  0x73   :  { %841 = vmatprep.subr.bf16.mxu1 %v840_v50 }
  0x75   :  { %811 = vmatpush3.bf16.msra.mxu0 %v810_v54 }
  0x76   :  { %843 = vmatpush3.bf16.msra.mxu1 %v842_v58  ;;  %813 = vmatprep.subr.bf16.mxu0 %v812_v59 }
  0x77   :  { %845 = vmatprep.subr.bf16.mxu1 %v844_v62 }
  0x79   :  { %815 = vmatpush3.bf16.msra.mxu0 %v814_v2 }
  0x7a   :  { %847 = vmatpush3.bf16.msra.mxu1 %v846_v3 }
 0x12e   :  { %v293_v15 = vpop.f32.mrb[0].mxu0 }
 0x12f   :  { %v1055_v16 = vadd.f32 %v293_v15, %v210_v11  ;;  %v370_v17 = vpop.f32.mrb[0].mxu1  ;;  %v295_v18 = vpop.f32.mrb[1].mxu0 }
 0x130   :  { %v1057_v19 = vadd.f32 %v370_v17, %v218_v12  ;;  %v296_v20 = vadd.f32 %v295_v18, %v214_v13  ;;  %v372_v21 = vpop.f32.mrb[1].mxu1 }
 0x131   :  { %v389_v22 = vmul.f32 0.044715, %v1055_v16  ;;  %v1060_v23 = vadd.f32 %v372_v21, %v222_v14 }
 0x132   :  { %v391_v24 = vmul.f32 0.044715, %v1057_v19  ;;  %v390_v25 = vmul.f32 0.044715, %v296_v20  ;;  %v299_v26 = vpop.f32.mrb[2].mxu0 }
 0x133   :  { %v397_v27 = vmul.f32 %v389_v22, %v1055_v16  ;;  %v392_v28 = vmul.f32 0.044715, %v1060_v23  ;;  %v1065_v29 = vadd.f32 %v299_v26, %v210_v11  ;;  %v376_v30 = vpop.f32.mrb[2].mxu1  ;;  %v301_v31 = vpop.f32.mrb[3].mxu0  ;;  %v382_v11 = vmul.f32 0.5, %v296_v20 }
 0x134   :  { %v399_v32 = vmul.f32 %v391_v24, %v1057_v19  ;;  %v398_v33 = vmul.f32 %v390_v25, %v296_v20  ;;  %v1068_v34 = vadd.f32 %v376_v30, %v218_v12  ;;  %v302_v35 = vadd.f32 %v301_v31, %v214_v13  ;;  %v378_v36 = vpop.f32.mrb[3].mxu1 }
 0x135   :  { %v405_v37 = vmul.f32 %v397_v27, %v1055_v16  ;;  %v400_v38 = vmul.f32 %v392_v28, %v1060_v23  ;;  %v393_v39 = vmul.f32 0.044715, %v1065_v29  ;;  %v379_v40 = vadd.f32 %v378_v36, %v222_v14 }
 0x136   :  { %v407_v41 = vmul.f32 %v399_v32, %v1057_v19  ;;  %v395_v42 = vmul.f32 0.044715, %v1068_v34  ;;  %v394_v43 = vmul.f32 0.044715, %v302_v35  ;;  %v406_v44 = vmul.f32 %v398_v33, %v296_v20 }
 0x137   :  { %v413_v45 = vadd.f32 %v405_v37, %v1055_v16  ;;  %v396_v46 = vmul.f32 0.044715, %v379_v40  ;;  %v401_v48 = vmul.f32 %v393_v39, %v1065_v29  ;;  %v408_v54 = vmul.f32 %v400_v38, %v1060_v23 }
 0x138   :  { %v415_v47 = vadd.f32 %v407_v41, %v1057_v19  ;;  %v402_v49 = vmul.f32 %v394_v43, %v302_v35  ;;  %v414_v50 = vadd.f32 %v406_v44, %v296_v20  ;;  %v403_v52 = vmul.f32 %v395_v42, %v1068_v34 }
 0x139   :  { %v421_v51 = vmul.f32 0.7978846, %v413_v45  ;;  %v404_v53 = vmul.f32 %v396_v46, %v379_v40  ;;  %v416_v58 = vadd.f32 %v408_v54, %v1060_v23  ;;  %v409_v60 = vmul.f32 %v401_v48, %v1065_v29 }
 0x13a   :  { %v423_v55 = vmul.f32 0.7978846, %v415_v47  ;;  %v422_v56 = vmul.f32 0.7978846, %v414_v50  ;;  %v410_v57 = vmul.f32 %v402_v49, %v302_v35  ;;  %v411_v63 = vmul.f32 %v403_v52, %v1068_v34 }
 0x13b   :  { %857 = vtanh.f32 %v421_v51  ;;  %v412_v59 = vmul.f32 %v404_v53, %v379_v40  ;;  %v424_v61 = vmul.f32 0.7978846, %v416_v58  ;;  %v417_v2 = vadd.f32 %v409_v60, %v1065_v29 }
 0x13c   :  { %859 = vtanh.f32 %v423_v55  ;;  %v418_v0 = vadd.f32 %v410_v57, %v302_v35  ;;  %v419_v4 = vadd.f32 %v411_v63, %v1068_v34  ;;  %v381_v14 = vmul.f32 0.5, %v1055_v16 }
 0x13d   :  { %861 = vtanh.f32 %v422_v56  ;;  %v420_v62 = vadd.f32 %v412_v59, %v379_v40  ;;  %v425_v5 = vmul.f32 0.7978846, %v417_v2  ;;  %v384_v21 = vmul.f32 0.5, %v1060_v23 }
 0x13e   :  { %v426_v1 = vmul.f32 0.7978846, %v418_v0  ;;  %863 = vtanh.f32 %v424_v61  ;;  %v427_v6 = vmul.f32 0.7978846, %v419_v4  ;;  %v383_v25 = vmul.f32 0.5, %v1057_v19 }
 0x13f   :  { %v428_v3 = vmul.f32 0.7978846, %v420_v62  ;;  %v386_v27 = vmul.f32 0.5, %v302_v35  ;;  %v388_v20 = vmul.f32 0.5, %v379_v40  ;;  %v385_v37 = vmul.f32 0.5, %v1065_v29 }
 0x140   :  { %865 = vtanh.f32 %v426_v1  ;;  %v387_v35 = vmul.f32 0.5, %v1068_v34  ;;  %v643_v34 = vld [vmem:[%s1112_s4] ss:$0 sm:$0xff] }
 0x141   :  { %867 = vtanh.f32 %v428_v3 }
 0x142   :  { %869 = vtanh.f32 %v425_v5 }
 0x143   :  { %871 = vtanh.f32 %v427_v6 }
 0x145   :  { %v858_v7 = vpop.eup %857 }
 0x146   :  { %v860_v8 = vpop.eup %859  ;;  %v437_v10 = vadd.f32 1.0, %v858_v7 }
 0x147   :  { %v862_v9 = vpop.eup %861  ;;  %v439_v15 = vadd.f32 1.0, %v860_v8 }
 0x148   :  { %v438_v12 = vadd.f32 1.0, %v862_v9  ;;  %v864_v13 = vpop.eup %863  ;;  %v445_v26 = vmul.f32 %v437_v10, %v381_v14 }
 0x149   :  { %v440_v22 = vadd.f32 1.0, %v864_v13  ;;  %v447_v16 = vmul.f32 %v439_v15, %v383_v25 }
 0x14a   :  { %v866_v17 = vpop.eup %865  ;;  %v446_v18 = vmul.f32 %v438_v12, %v382_v11 }
 0x14b   :  { %v868_v24 = vpop.eup %867  ;;  %v442_v28 = vadd.f32 1.0, %v866_v17  ;;  %v448_v31 = vmul.f32 %v440_v22, %v384_v21 }
 0x14c   :  { %v870_v30 = vpop.eup %869  ;;  %519 = vmatprep.mubr.f32.mxu0 %v446_v18  ;;  %v444_v32 = vadd.f32 1.0, %v868_v24 }
 0x14d   :  { %v872_v33 = vpop.eup %871  ;;  %520 = vmatmul.mubr.f32.vlgmr.msra.gmra.mrb[4].mxu0 %v445_v26  ;;  %v450_v36 = vmul.f32 %v442_v28, %v386_v27  ;;  %v441_v38 = vadd.f32 1.0, %v870_v30  ;;  %594 = vmatprep.mubr.f32.mxu1 %v448_v31 }
 0x14e   :  { %v452_v23 = vmul.f32 %v444_v32, %v388_v20  ;;  %v443_v39 = vadd.f32 1.0, %v872_v33  ;;  %595 = vmatmul.mubr.f32.vlgmr.msra.gmra.mrb[4].mxu1 %v447_v16 }
 0x14f   :  { %524 = vmatprep.mubr.f32.mxu0 %v450_v36  ;;  %v449_v19 = vmul.f32 %v441_v38, %v385_v37 }
 0x150   :  { %599 = vmatprep.mubr.f32.mxu1 %v452_v23  ;;  %v451_v41 = vmul.f32 %v443_v39, %v387_v35 }
 0x151   :  { %525 = vmatmul.mubr.f32.gmra.mrb[6].mxu0 %v449_v19 }
 0x152   :  { %600 = vmatmul.mubr.f32.gmra.mrb[6].mxu1 %v451_v41 }
 0x220   :  { %v676_v40 = vpop.f32.mrb[4].mxu0 }
 0x221   :  { %v677_v42 = vpop.f32.mrb[5].mxu0  ;;  %v714_v43 = vpop.f32.mrb[4].mxu1 }
 0x222   :  { %v678_v44 = vadd.f32 %v677_v42, %v676_v40  ;;  %v715_v45 = vpop.f32.mrb[5].mxu1 }
 0x223   :  { %v716_v46 = vadd.f32 %v715_v45, %v714_v43 }
 0x224   :  { %v679_v29 = vpop.f32.mrb[6].mxu0 }
 0x225   :  { %v680_v47 = vpop.f32.mrb[7].mxu0  ;;  %v597_v48 = vadd.f32 %v716_v46, %v678_v44  ;;  %v717_v49 = vpop.f32.mrb[6].mxu1 }
 0x226   :  { %v681_v50 = vadd.f32 %v680_v47, %v679_v29  ;;  %v718_v51 = vpop.f32.mrb[7].mxu1 }
 0x227   :  { %v719_v52 = vadd.f32 %v718_v51, %v717_v49  ;;  %v621_v54 = vadd.f32 %v643_v34, %v597_v48 }
 0x229   :  { %v602_v53 = vadd.f32 %v719_v52, %v681_v50  ;;  %623 = vst [vmem:[#allocation8] sm:$0xff] %v621_v54 }
 0x22b   :  { %v622_v55 = vadd.f32 %v643_v34, %v602_v53 }
 0x22d   :  { %624 = vst [vmem:[#allocation8 + $0x8] sm:$0xff] %v622_v55 }
 0x22e   :  { %950 = shalt.err (!%p947_p0)
}
 0x22f   :  { %s951_s4 = scalar_lea.hbm %s1113_s5, 256 }
 0x230   :  { %p952_p1 = scmp.ne.s32.totalorder %s1113_s5, %s951_s4  ;;  %p955_p2 = scmp.lt.u32.totalorder %s951_s4, %s1113_s5 }
 0x232   :  { %p957_p3 = pnand %p955_p2, %p952_p1 }
 0x234   :  { %960 = shalt.err (!%p957_p3)
}
 0x235   :  { %636 = dma.vmem_to_hbm [thread:$0]  %s631_s9, 256, %s1113_s5, [#allocation4], %s971_s1, %s971_s1, %s972_s17  }
 0x236   :  { %965 = dma.done.wait [#allocation4], 256  }
 0x237   :  { %966 = vsyncadd [#allocation4], 4294967040 }
 0x238   :  { %640 = vsyncpa [#allocation3], 1 }
 0x239   :  { %641 = vsyncpa [#allocation6], 1 }
 0x23a   :  { %642 = vsyncpa [#allocation4], 1 }

</bundles_post_ra>
